<compile_context>
chip_gen: v6e
topology: v6e:2x2x1
jax: 0.10.0
libtpu: 0.0.40
codegen_flags: <defaults>
</compile_context>

<pallas_src>
import functools

import jax
import jax.numpy as jnp
from jax.experimental import pallas as pl
from jax.experimental.pallas import tpu as pltpu

LANE = 128


def _round_up(x, m):
    return (x + m - 1) // m * m


# ----------------------------- Pallas kernel -------------------------------


def _ivae_kernel(x_ref, u_ref, eps_ref, w_ref, b_ref, out_ref, *,
                 latent_dim, data_dim, hidden_dim, lay):
    L, D, H = latent_dim, data_dim, hidden_dim
    wdt = w_ref.dtype

    def leaky(h):  # nn.LeakyReLU(negative_slope=0.01)
        return jnp.where(h >= 0, h, 0.01 * h)

    def mm(a, row, k, brow):
        w = w_ref[row:row + k, :]                       # (k, 128), zero padded
        return (jnp.dot(a.astype(wdt), w, preferred_element_type=jnp.float32)
                + b_ref[brow:brow + 1, :])

    x = x_ref[...]              # (tm, D)
    u = u_ref[...]              # (tm, A)
    eps = eps_ref[...]          # (tm, L)

    # Stage 1: fused first layers of g / logv / logl  -> (tm, 128)
    #   cols [0:H]=g, [H:2H]=logv, [2H:3H]=logl (x rows of logl are zero).
    wd = w_ref[lay["rd"]:lay["rd"] + lay["kd"], :]
    wu = w_ref[lay["ru"]:lay["ru"] + lay["ku"], :]
    raw1 = (jnp.dot(x.astype(wdt), wd, preferred_element_type=jnp.float32)
            + jnp.dot(u.astype(wdt), wu, preferred_element_type=jnp.float32)
            + b_ref[0:1, :])
    h1 = leaky(raw1)

    # Stage 2: fused second layers of g / logv + output layer of logl.
    #   cols [0:H]=g, [H:2H]=logv, [2H:2H+L]=log prior_var.
    raw2 = mm(h1, lay["r2"], LANE, 1)
    prior_var = jnp.exp(raw2[:, 2 * H:2 * H + L])       # (tm, L)
    h2 = leaky(raw2)            # harmless on logl/pad cols (stage-3 rows zero)

    # Stage 3: fused output layers of g / logv.
    #   cols [0:L]=mean_z, [L:2L]=log var_z.
    raw3 = mm(h2, lay["r3"], LANE, 2)
    mean_z = raw3[:, 0:L]
    std = jnp.exp(0.5 * raw3[:, L:2 * L])               # EUP; no sqrt needed
    var_z = std * std

    # Reparameterization: z = std * eps + mean_z
    z = std * eps + mean_z                              # (tm, L)

    # Decoder f(z): L -> H -> H -> D (recon columns pre-placed at [4L:4L+D]).
    hf = leaky(mm(z, lay["r4"], lay["k4"], 3))
    hf = leaky(mm(hf, lay["r5"], LANE, 4))
    raw6 = mm(hf, lay["r6"], LANE, 5)

    # Lane-aligned slice stores into the (tm, 4L+D) output slab (no concat).
    out_ref[:, 0:L] = mean_z
    out_ref[:, L:2 * L] = var_z
    out_ref[:, 2 * L:3 * L] = z
    out_ref[:, 3 * L:4 * L] = prior_var
    out_ref[:, 4 * L:4 * L + D] = raw6[:, 4 * L:4 * L + D]


# --------------------------- weight pre-packing -----------------------------


def pack_params(p, latent_dim, data_dim, aux_dim, hidden_dim,
                w_dtype=jnp.bfloat16):
    """Pack all Linear weights into one (R,128) bf16 slab + one (8,128) f32 bias slab."""
    L, D, H, A = latent_dim, data_dim, hidden_dim, aux_dim
    assert 3 * H <= LANE and 2 * H + L <= LANE and 2 * L <= LANE
    assert H <= LANE and 4 * L + D <= LANE

    align = 16                                # bf16 sublane-pair friendly rows
    rd, kd = 0, D                             # stage-1 x rows
    ru, ku = rd + _round_up(kd, align), A     # stage-1 u rows
    r2 = ru + _round_up(ku, align)            # stage-2 (128 rows)
    r3 = r2 + LANE                            # stage-3 (128 rows)
    r4, k4 = r3 + LANE, L                     # decoder f1 (L rows)
    r5 = r4 + _round_up(k4, align)            # decoder f2 (128 rows)
    r6 = r5 + LANE                            # decoder f3 (128 rows)
    R = r6 + LANE

    W = jnp.zeros((R, LANE), jnp.float32)
    B = jnp.zeros((8, LANE), jnp.float32)

    # Stage 1: [x | u] -> [g(H) | v(H) | l(H)]   (logl reads u only)
    W = W.at[rd:rd + D, 0:H].set(p["gw1"][:D])
    W = W.at[rd:rd + D, H:2 * H].set(p["vw1"][:D])
    W = W.at[ru:ru + A, 0:H].set(p["gw1"][D:])
    W = W.at[ru:ru + A, H:2 * H].set(p["vw1"][D:])
    W = W.at[ru:ru + A, 2 * H:3 * H].set(p["lw1"])
    B = B.at[0, 0:H].set(p["gb1"][0])
    B = B.at[0, H:2 * H].set(p["vb1"][0])
    B = B.at[0, 2 * H:3 * H].set(p["lb1"][0])

    # Stage 2 (block diagonal): h1 -> [g(H) | v(H) | prior_logvar(L)]
    W = W.at[r2:r2 + H, 0:H].set(p["gw2"])
    W = W.at[r2 + H:r2 + 2 * H, H:2 * H].set(p["vw2"])
    W = W.at[r2 + 2 * H:r2 + 3 * H, 2 * H:2 * H + L].set(p["lw2"])
    B = B.at[1, 0:H].set(p["gb2"][0])
    B = B.at[1, H:2 * H].set(p["vb2"][0])
    B = B.at[1, 2 * H:2 * H + L].set(p["lb2"][0])

    # Stage 3 (block diagonal): h2 -> [mean(L) | logvar(L)]
    W = W.at[r3:r3 + H, 0:L].set(p["gw3"])
    W = W.at[r3 + H:r3 + 2 * H, L:2 * L].set(p["vw3"])
    B = B.at[2, 0:L].set(p["gb3"][0])
    B = B.at[2, L:2 * L].set(p["vb3"][0])

    # Decoder f: L -> H -> H -> D ; recon columns placed at [4L:4L+D]
    W = W.at[r4:r4 + L, 0:H].set(p["fw1"])
    B = B.at[3, 0:H].set(p["fb1"][0])
    W = W.at[r5:r5 + H, 0:H].set(p["fw2"])
    B = B.at[4, 0:H].set(p["fb2"][0])
    W = W.at[r6:r6 + H, 4 * L:4 * L + D].set(p["fw3"])
    B = B.at[5, 4 * L:4 * L + D].set(p["fb3"][0])

    lay = dict(rd=rd, kd=kd, ru=ru, ku=ku, r2=r2, r3=r3,
               r4=r4, k4=k4, r5=r5, r6=r6, R=R)
    return W.astype(w_dtype), B, lay


# ------------------------------ wrapper ------------------------------------


def _pick_tile(M, batch_tile):
    if M % 8 != 0:
        return M                      # ragged batch: single full-dim block
    tm = min(batch_tile, M)
    # Ensure >= 2 grid steps when possible so both v7x TensorCores get work.
    if tm == M and M >= 16 and (M // 2) % 8 == 0:
        tm = M // 2
    tm = max(8, (tm // 8) * 8)
    while M % tm:
        tm -= 8
    return tm


def ivae_forward(data, aux, eps, W, B, lay, *, latent_dim, data_dim, aux_dim,
                 hidden_dim, batch_tile=1024):
    """Pallas implementation of iVAE_anneal.forward.

    Returns (mean_z, var_z, recon_x, sampled_z, prior_mean, prior_var).
    decoder_var = 0.01 is a module constant handled by the caller.
    """
    M = data.shape[0]
    L, D = latent_dim, data_dim
    OUT = 4 * L + D                       # [mean | var | z | prior_var | recon]
    tm = _pick_tile(M, batch_tile)
    grid = (M // tm,)

    kernel = functools.partial(
        _ivae_kernel, latent_dim=L, data_dim=D, hidden_dim=hidden_dim, lay=lay)

    out = pl.pallas_call(
        kernel,
        out_shape=jax.ShapeDtypeStruct((M, OUT), jnp.float32),
        grid=grid,
        in_specs=[
            pl.BlockSpec((tm, data_dim), lambda i: (i, 0)),      # x tile
            pl.BlockSpec((tm, aux_dim), lambda i: (i, 0)),       # u tile
            pl.BlockSpec((tm, L), lambda i: (i, 0)),             # eps tile
            pl.BlockSpec((lay["R"], LANE), lambda i: (0, 0)),    # weight slab
            pl.BlockSpec((8, LANE), lambda i: (0, 0)),           # bias slab
        ],
        out_specs=pl.BlockSpec((tm, OUT), lambda i: (i, 0)),
        compiler_params=pltpu.CompilerParams(
            dimension_semantics=("parallel",),
            vmem_limit_bytes=32 * 1024 * 1024),
    )(data, aux, eps, W, B)

    mean_z = out[:, 0:L]
    var_z = out[:, L:2 * L]
    sampled_z = out[:, 2 * L:3 * L]
    prior_var = out[:, 3 * L:4 * L]
    recon_x = out[:, 4 * L:4 * L + D]
    prior_mean = jnp.zeros((L,), dtype=jnp.float32)
    return mean_z, var_z, recon_x, sampled_z, prior_mean, prior_var


# ------------------------- deterministic params ----------------------------


def xavier_uniform(key, in_dim, out_dim):
    bound = jnp.sqrt(6.0 / (in_dim + out_dim))
    return jax.random.uniform(
        key, (in_dim, out_dim), jnp.float32, minval=-bound, maxval=bound)


def bias_init(key, in_dim, out_dim):
    # PyTorch Linear default bias init: U(-1/sqrt(fan_in), 1/sqrt(fan_in)).
    bound = 1.0 / jnp.sqrt(jnp.float32(in_dim))
    return jax.random.uniform(
        key, (1, out_dim), jnp.float32, minval=-bound, maxval=bound)


def make_params(key, latent_dim, data_dim, aux_dim, hidden_dim):
    keys = jax.random.split(key, 32)
    k = iter(keys)
    p = {}
    # logl: aux -> hidden -> latent
    p["lw1"] = xavier_uniform(next(k), aux_dim, hidden_dim)
    p["lb1"] = bias_init(next(k), aux_dim, hidden_dim)
    p["lw2"] = xavier_uniform(next(k), hidden_dim, latent_dim)
    p["lb2"] = bias_init(next(k), hidden_dim, latent_dim)
    # g: data+aux -> hidden -> hidden -> latent
    p["gw1"] = xavier_uniform(next(k), data_dim + aux_dim, hidden_dim)
    p["gb1"] = bias_init(next(k), data_dim + aux_dim, hidden_dim)
    p["gw2"] = xavier_uniform(next(k), hidden_dim, hidden_dim)
    p["gb2"] = bias_init(next(k), hidden_dim, hidden_dim)
    p["gw3"] = xavier_uniform(next(k), hidden_dim, latent_dim)
    p["gb3"] = bias_init(next(k), hidden_dim, latent_dim)
    # logv: data+aux -> hidden -> hidden -> latent
    p["vw1"] = xavier_uniform(next(k), data_dim + aux_dim, hidden_dim)
    p["vb1"] = bias_init(next(k), data_dim + aux_dim, hidden_dim)
    p["vw2"] = xavier_uniform(next(k), hidden_dim, hidden_dim)
    p["vb2"] = bias_init(next(k), hidden_dim, hidden_dim)
    p["vw3"] = xavier_uniform(next(k), hidden_dim, latent_dim)
    p["vb3"] = bias_init(next(k), hidden_dim, latent_dim)
    # f: latent -> hidden -> hidden -> data
    p["fw1"] = xavier_uniform(next(k), latent_dim, hidden_dim)
    p["fb1"] = bias_init(next(k), latent_dim, hidden_dim)
    p["fw2"] = xavier_uniform(next(k), hidden_dim, hidden_dim)
    p["fb2"] = bias_init(next(k), hidden_dim, hidden_dim)
    p["fw3"] = xavier_uniform(next(k), hidden_dim, data_dim)
    p["fb3"] = bias_init(next(k), hidden_dim, data_dim)
    return p


# ------------------------- pure-JAX reference ------------------------------


def ivae_forward_ref(data, aux, eps, p):
    leaky = lambda h: jnp.where(h >= 0, h, 0.01 * h)
    lin = lambda a, w, b: a @ w + b
    xu = jnp.concatenate([data, aux], axis=1)
    h = leaky(lin(aux, p["lw1"], p["lb1"]))
    prior_var = jnp.exp(lin(h, p["lw2"], p["lb2"]))
    h = leaky(lin(xu, p["gw1"], p["gb1"]))
    h = leaky(lin(h, p["gw2"], p["gb2"]))
    mean_z = lin(h, p["gw3"], p["gb3"])
    h = leaky(lin(xu, p["vw1"], p["vb1"]))
    h = leaky(lin(h, p["vw2"], p["vb2"]))
    var_z = jnp.exp(lin(h, p["vw3"], p["vb3"]))
    z = jnp.sqrt(var_z) * eps + mean_z
    h = leaky(lin(z, p["fw1"], p["fb1"]))
    h = leaky(lin(h, p["fw2"], p["fb2"]))
    recon = lin(h, p["fw3"], p["fb3"])
    return mean_z, var_z, recon, z, prior_var


# --------------------------------- main -------------------------------------


if __name__ == "__main__":
    latent_dim, data_dim, aux_dim, hidden_dim = 8, 16, 8, 32
    batch = 16

    key = jax.random.PRNGKey(0)
    k_param, k_x, k_u, k_eps = jax.random.split(key, 4)

    params = make_params(k_param, latent_dim, data_dim, aux_dim, hidden_dim)
    W, B, lay = pack_params(params, latent_dim, data_dim, aux_dim, hidden_dim)

    data = jax.random.normal(k_x, (batch, data_dim), jnp.float32)
    aux = jax.random.normal(k_u, (batch, aux_dim), jnp.float32)
    # torch.randn equivalent for the reparameterization trick (glue).
    eps = jax.random.normal(k_eps, (batch, latent_dim), jnp.float32)
    decoder_var = jnp.full((1,), 0.01, jnp.float32)  # self.decoder_var

    fwd = functools.partial(
        ivae_forward,
        latent_dim=latent_dim, data_dim=data_dim, aux_dim=aux_dim,
        hidden_dim=hidden_dim, batch_tile=1024)

    outs = jax.block_until_ready(fwd(data, aux, eps, W, B, lay))
    mean_z, var_z, recon_x, sampled_z, prior_mean, prior_var = outs

    # sanity check against pure-JAX reference (bf16 MXU operands -> 5e-2 tol)
    ref = ivae_forward_ref(data, aux, eps, params)
    for got, want in zip((mean_z, var_z, recon_x, sampled_z, prior_var), ref):
        assert got.shape == want.shape
        assert bool(jnp.all(jnp.isfinite(got)))
        assert bool(jnp.allclose(got, want, rtol=5e-2, atol=5e-2))
    assert prior_mean.shape == (latent_dim,)
    assert abs(float(decoder_var[0]) - 0.01) < 1e-6  # f32 vs python float

    # TODO(synk): elbo()/anneal() (log-pdf reductions, logsumexp) stay in JAX.
    print("KERNEL_OK")
</pallas_src>

<mosaic_0001>
module attributes {stable_mosaic.version = 11 : i64} {
  func.func @_ivae_kernel(%arg0: i32, %arg1: memref<8x16xf32, #tpu.memory_space<vmem>>, %arg2: memref<8x8xf32, #tpu.memory_space<vmem>>, %arg3: memref<8x8xf32, #tpu.memory_space<vmem>>, %arg4: memref<560x128xbf16, #tpu.memory_space<vmem>>, %arg5: memref<8x128xf32, #tpu.memory_space<vmem>>, %arg6: memref<8x48xf32, #tpu.memory_space<vmem>>) attributes {dimension_semantics = [#tpu.dimension_semantics<parallel>], iteration_bounds = array<i64: 2>, scalar_prefetch = 0 : i64, scratch_operands = 0 : i64, tpu.core_type = #tpu.core_type<tc>, window_params = [{transform_indices = @transform_0, window_bounds = array<i64: 8, 16>}, {transform_indices = @transform_1, window_bounds = array<i64: 8, 8>}, {transform_indices = @transform_2, window_bounds = array<i64: 8, 8>}, {pipeline_mode = #tpu.pipeline_mode<synchronous>, transform_indices = @transform_3, window_bounds = array<i64: 560, 128>}, {pipeline_mode = #tpu.pipeline_mode<synchronous>, transform_indices = @transform_4, window_bounds = array<i64: 8, 128>}, {transform_indices = @transform_5, window_bounds = array<i64: 8, 48>}]} {
    %c0 = arith.constant 0 : index
    %c0_0 = arith.constant 0 : index
    %0 = vector.load %arg1[%c0, %c0_0] : memref<8x16xf32, #tpu.memory_space<vmem>>, vector<8x16xf32>
    %c0_1 = arith.constant 0 : index
    %c0_2 = arith.constant 0 : index
    %1 = vector.load %arg2[%c0_1, %c0_2] : memref<8x8xf32, #tpu.memory_space<vmem>>, vector<8x8xf32>
    %c0_3 = arith.constant 0 : index
    %c0_4 = arith.constant 0 : index
    %2 = vector.load %arg3[%c0_3, %c0_4] : memref<8x8xf32, #tpu.memory_space<vmem>>, vector<8x8xf32>
    %c0_5 = arith.constant 0 : index
    %c0_6 = arith.constant 0 : index
    %3 = vector.load %arg4[%c0_5, %c0_6] : memref<560x128xbf16, #tpu.memory_space<vmem>>, vector<16x128xbf16>
    %c16 = arith.constant 16 : index
    %c0_7 = arith.constant 0 : index
    %4 = vector.load %arg4[%c16, %c0_7] : memref<560x128xbf16, #tpu.memory_space<vmem>>, vector<8x128xbf16>
    %5 = arith.truncf %0 : vector<8x16xf32> to vector<8x16xbf16>
    %cst = arith.constant dense<0.000000e+00> : vector<8x128xf32>
    %6 = tpu.matmul %5, %3, %cst {dimension_numbers = #tpu.dot_dimension_numbers<[1], [0], [0], [1], [0, 0, 1, 1], [], []>} : vector<8x16xbf16>, vector<16x128xbf16>, vector<8x128xf32> -> vector<8x128xf32>
    %7 = arith.truncf %1 : vector<8x8xf32> to vector<8x8xbf16>
    %cst_8 = arith.constant dense<0.000000e+00> : vector<8x128xf32>
    %8 = tpu.matmul %7, %4, %cst_8 {dimension_numbers = #tpu.dot_dimension_numbers<[1], [0], [0], [1], [0, 0, 1, 1], [], []>} : vector<8x8xbf16>, vector<8x128xbf16>, vector<8x128xf32> -> vector<8x128xf32>
    %9 = arith.addf %6, %8 : vector<8x128xf32>
    %c0_9 = arith.constant 0 : index
    %c0_10 = arith.constant 0 : index
    %10 = vector.load %arg5[%c0_9, %c0_10] : memref<8x128xf32, #tpu.memory_space<vmem>>, vector<1x128xf32>
    %11 = vector.broadcast %10 : vector<1x128xf32> to vector<8x128xf32>
    %12 = arith.addf %9, %11 : vector<8x128xf32>
    %cst_11 = arith.constant 0.000000e+00 : f32
    %13 = vector.broadcast %cst_11 : f32 to vector<8x128xf32>
    %14 = arith.cmpf oge, %12, %13 : vector<8x128xf32>
    %cst_12 = arith.constant 0.00999999977 : f32
    %15 = vector.broadcast %cst_12 : f32 to vector<8x128xf32>
    %16 = arith.mulf %15, %12 : vector<8x128xf32>
    %17 = arith.select %14, %12, %16 : vector<8x128xi1>, vector<8x128xf32>
    %c32 = arith.constant 32 : index
    %c0_13 = arith.constant 0 : index
    %18 = vector.load %arg4[%c32, %c0_13] : memref<560x128xbf16, #tpu.memory_space<vmem>>, vector<128x128xbf16>
    %19 = arith.truncf %17 : vector<8x128xf32> to vector<8x128xbf16>
    %cst_14 = arith.constant dense<0.000000e+00> : vector<8x128xf32>
    %20 = tpu.matmul %19, %18, %cst_14 {dimension_numbers = #tpu.dot_dimension_numbers<[1], [0], [0], [1], [0, 0, 1, 1], [], []>} : vector<8x128xbf16>, vector<128x128xbf16>, vector<8x128xf32> -> vector<8x128xf32>
    %c1 = arith.constant 1 : index
    %c0_15 = arith.constant 0 : index
    %21 = vector.load %arg5[%c1, %c0_15] : memref<8x128xf32, #tpu.memory_space<vmem>>, vector<1x128xf32>
    %22 = vector.broadcast %21 : vector<1x128xf32> to vector<8x128xf32>
    %23 = arith.addf %20, %22 : vector<8x128xf32>
    %24 = vector.extract_strided_slice %23 {offsets = [0, 64], sizes = [8, 8], strides = [1, 1]} : vector<8x128xf32> to vector<8x8xf32>
    %25 = math.exp %24 : vector<8x8xf32>
    %cst_16 = arith.constant 0.000000e+00 : f32
    %26 = vector.broadcast %cst_16 : f32 to vector<8x128xf32>
    %27 = arith.cmpf oge, %23, %26 : vector<8x128xf32>
    %cst_17 = arith.constant 0.00999999977 : f32
    %28 = vector.broadcast %cst_17 : f32 to vector<8x128xf32>
    %29 = arith.mulf %28, %23 : vector<8x128xf32>
    %30 = arith.select %27, %23, %29 : vector<8x128xi1>, vector<8x128xf32>
    %c160 = arith.constant 160 : index
    %c0_18 = arith.constant 0 : index
    %31 = vector.load %arg4[%c160, %c0_18] : memref<560x128xbf16, #tpu.memory_space<vmem>>, vector<128x128xbf16>
    %32 = arith.truncf %30 : vector<8x128xf32> to vector<8x128xbf16>
    %cst_19 = arith.constant dense<0.000000e+00> : vector<8x128xf32>
    %33 = tpu.matmul %32, %31, %cst_19 {dimension_numbers = #tpu.dot_dimension_numbers<[1], [0], [0], [1], [0, 0, 1, 1], [], []>} : vector<8x128xbf16>, vector<128x128xbf16>, vector<8x128xf32> -> vector<8x128xf32>
    %c2 = arith.constant 2 : index
    %c0_20 = arith.constant 0 : index
    %34 = vector.load %arg5[%c2, %c0_20] : memref<8x128xf32, #tpu.memory_space<vmem>>, vector<1x128xf32>
    %35 = vector.broadcast %34 : vector<1x128xf32> to vector<8x128xf32>
    %36 = arith.addf %33, %35 : vector<8x128xf32>
    %37 = vector.extract_strided_slice %36 {offsets = [0, 0], sizes = [8, 8], strides = [1, 1]} : vector<8x128xf32> to vector<8x8xf32>
    %38 = vector.extract_strided_slice %36 {offsets = [0, 8], sizes = [8, 8], strides = [1, 1]} : vector<8x128xf32> to vector<8x8xf32>
    %cst_21 = arith.constant 5.000000e-01 : f32
    %39 = vector.broadcast %cst_21 : f32 to vector<8x8xf32>
    %40 = arith.mulf %39, %38 : vector<8x8xf32>
    %41 = math.exp %40 : vector<8x8xf32>
    %42 = arith.mulf %41, %41 : vector<8x8xf32>
    %43 = arith.mulf %41, %2 : vector<8x8xf32>
    %44 = arith.addf %43, %37 : vector<8x8xf32>
    %c288 = arith.constant 288 : index
    %c0_22 = arith.constant 0 : index
    %45 = vector.load %arg4[%c288, %c0_22] : memref<560x128xbf16, #tpu.memory_space<vmem>>, vector<8x128xbf16>
    %46 = arith.truncf %44 : vector<8x8xf32> to vector<8x8xbf16>
    %cst_23 = arith.constant dense<0.000000e+00> : vector<8x128xf32>
    %47 = tpu.matmul %46, %45, %cst_23 {dimension_numbers = #tpu.dot_dimension_numbers<[1], [0], [0], [1], [0, 0, 1, 1], [], []>} : vector<8x8xbf16>, vector<8x128xbf16>, vector<8x128xf32> -> vector<8x128xf32>
    %c3 = arith.constant 3 : index
    %c0_24 = arith.constant 0 : index
    %48 = vector.load %arg5[%c3, %c0_24] : memref<8x128xf32, #tpu.memory_space<vmem>>, vector<1x128xf32>
    %49 = vector.broadcast %48 : vector<1x128xf32> to vector<8x128xf32>
    %50 = arith.addf %47, %49 : vector<8x128xf32>
    %cst_25 = arith.constant 0.000000e+00 : f32
    %51 = vector.broadcast %cst_25 : f32 to vector<8x128xf32>
    %52 = arith.cmpf oge, %50, %51 : vector<8x128xf32>
    %cst_26 = arith.constant 0.00999999977 : f32
    %53 = vector.broadcast %cst_26 : f32 to vector<8x128xf32>
    %54 = arith.mulf %53, %50 : vector<8x128xf32>
    %55 = arith.select %52, %50, %54 : vector<8x128xi1>, vector<8x128xf32>
    %c304 = arith.constant 304 : index
    %c0_27 = arith.constant 0 : index
    %56 = vector.load %arg4[%c304, %c0_27] : memref<560x128xbf16, #tpu.memory_space<vmem>>, vector<128x128xbf16>
    %57 = arith.truncf %55 : vector<8x128xf32> to vector<8x128xbf16>
    %cst_28 = arith.constant dense<0.000000e+00> : vector<8x128xf32>
    %58 = tpu.matmul %57, %56, %cst_28 {dimension_numbers = #tpu.dot_dimension_numbers<[1], [0], [0], [1], [0, 0, 1, 1], [], []>} : vector<8x128xbf16>, vector<128x128xbf16>, vector<8x128xf32> -> vector<8x128xf32>
    %c4 = arith.constant 4 : index
    %c0_29 = arith.constant 0 : index
    %59 = vector.load %arg5[%c4, %c0_29] : memref<8x128xf32, #tpu.memory_space<vmem>>, vector<1x128xf32>
    %60 = vector.broadcast %59 : vector<1x128xf32> to vector<8x128xf32>
    %61 = arith.addf %58, %60 : vector<8x128xf32>
    %cst_30 = arith.constant 0.000000e+00 : f32
    %62 = vector.broadcast %cst_30 : f32 to vector<8x128xf32>
    %63 = arith.cmpf oge, %61, %62 : vector<8x128xf32>
    %cst_31 = arith.constant 0.00999999977 : f32
    %64 = vector.broadcast %cst_31 : f32 to vector<8x128xf32>
    %65 = arith.mulf %64, %61 : vector<8x128xf32>
    %66 = arith.select %63, %61, %65 : vector<8x128xi1>, vector<8x128xf32>
    %c432 = arith.constant 432 : index
    %c0_32 = arith.constant 0 : index
    %67 = vector.load %arg4[%c432, %c0_32] : memref<560x128xbf16, #tpu.memory_space<vmem>>, vector<128x128xbf16>
    %68 = arith.truncf %66 : vector<8x128xf32> to vector<8x128xbf16>
    %cst_33 = arith.constant dense<0.000000e+00> : vector<8x128xf32>
    %69 = tpu.matmul %68, %67, %cst_33 {dimension_numbers = #tpu.dot_dimension_numbers<[1], [0], [0], [1], [0, 0, 1, 1], [], []>} : vector<8x128xbf16>, vector<128x128xbf16>, vector<8x128xf32> -> vector<8x128xf32>
    %c5 = arith.constant 5 : index
    %c0_34 = arith.constant 0 : index
    %70 = vector.load %arg5[%c5, %c0_34] : memref<8x128xf32, #tpu.memory_space<vmem>>, vector<1x128xf32>
    %71 = vector.broadcast %70 : vector<1x128xf32> to vector<8x128xf32>
    %72 = arith.addf %69, %71 : vector<8x128xf32>
    %c0_35 = arith.constant 0 : index
    %c0_36 = arith.constant 0 : index
    %73 = vector.load %arg6[%c0_35, %c0_36] : memref<8x48xf32, #tpu.memory_space<vmem>>, vector<8x8xf32>
    tpu.vector_store %arg6[%c0_35, %c0_36], %37 {strides = array<i32>} : memref<8x48xf32, #tpu.memory_space<vmem>>, vector<8x8xf32>,
    %c0_37 = arith.constant 0 : index
    %c8 = arith.constant 8 : index
    %74 = vector.load %arg6[%c0_37, %c8] : memref<8x48xf32, #tpu.memory_space<vmem>>, vector<8x8xf32>
    tpu.vector_store %arg6[%c0_37, %c8], %42 {strides = array<i32>} : memref<8x48xf32, #tpu.memory_space<vmem>>, vector<8x8xf32>,
    %c0_38 = arith.constant 0 : index
    %c16_39 = arith.constant 16 : index
    %75 = vector.load %arg6[%c0_38, %c16_39] : memref<8x48xf32, #tpu.memory_space<vmem>>, vector<8x8xf32>
    tpu.vector_store %arg6[%c0_38, %c16_39], %44 {strides = array<i32>} : memref<8x48xf32, #tpu.memory_space<vmem>>, vector<8x8xf32>,
    %c0_40 = arith.constant 0 : index
    %c24 = arith.constant 24 : index
    %76 = vector.load %arg6[%c0_40, %c24] : memref<8x48xf32, #tpu.memory_space<vmem>>, vector<8x8xf32>
    tpu.vector_store %arg6[%c0_40, %c24], %25 {strides = array<i32>} : memref<8x48xf32, #tpu.memory_space<vmem>>, vector<8x8xf32>,
    %77 = vector.extract_strided_slice %72 {offsets = [0, 32], sizes = [8, 16], strides = [1, 1]} : vector<8x128xf32> to vector<8x16xf32>
    %c0_41 = arith.constant 0 : index
    %c32_42 = arith.constant 32 : index
    %78 = vector.load %arg6[%c0_41, %c32_42] : memref<8x48xf32, #tpu.memory_space<vmem>>, vector<8x16xf32>
    tpu.vector_store %arg6[%c0_41, %c32_42], %77 {strides = array<i32>} : memref<8x48xf32, #tpu.memory_space<vmem>>, vector<8x16xf32>,
    return
  }
  func.func @transform_0(%arg0: i32) -> (i32, i32) {
    %c0_i32 = arith.constant 0 : i32
    %c0_i32_0 = arith.constant 0 : i32
    return %arg0, %c0_i32 : i32, i32
  }
  func.func @transform_1(%arg0: i32) -> (i32, i32) {
    %c0_i32 = arith.constant 0 : i32
    %c0_i32_0 = arith.constant 0 : i32
    return %arg0, %c0_i32 : i32, i32
  }
  func.func @transform_2(%arg0: i32) -> (i32, i32) {
    %c0_i32 = arith.constant 0 : i32
    %c0_i32_0 = arith.constant 0 : i32
    return %arg0, %c0_i32 : i32, i32
  }
  func.func @transform_3(%arg0: i32) -> (i32, i32) {
    %c0_i32 = arith.constant 0 : i32
    %c0_i32_0 = arith.constant 0 : i32
    %c0_i32_1 = arith.constant 0 : i32
    return %c0_i32, %c0_i32_0 : i32, i32
  }
  func.func @transform_4(%arg0: i32) -> (i32, i32) {
    %c0_i32 = arith.constant 0 : i32
    %c0_i32_0 = arith.constant 0 : i32
    %c0_i32_1 = arith.constant 0 : i32
    return %c0_i32, %c0_i32_0 : i32, i32
  }
  func.func @transform_5(%arg0: i32) -> (i32, i32) {
    %c0_i32 = arith.constant 0 : i32
    %c0_i32_0 = arith.constant 0 : i32
    return %arg0, %c0_i32 : i32, i32
  }
}

</mosaic_0001>

<bundles_post_ra>
// kernel: tpu_custom_call.1
= control target key start
LH: loop header
LB: loop body
LE: loop exit
PB: predicated region body
PF: predicated region fallthrough
CT: control target
= control target key end

     0   :  { %10 = vsyncpa [#allocation3], 0  ;;  %s1668_s0 = inlined_call_operand.vmem [shape: f32[16,16], index: 0, kind: input, shape index: {}]   ;;  %s1669_s1 = inlined_call_operand.vmem [shape: f32[16,8], index: 1, kind: input, shape index: {}]   ;;  %s1670_s2 = inlined_call_operand.vmem [shape: f32[16,8], index: 2, kind: input, shape index: {}]   ;;  %s1671_s3 = inlined_call_operand.hbm [shape: bf16[560,128], index: 3, kind: input, shape index: {}]   ;;  %s1672_s4 = inlined_call_operand.vmem [shape: f32[8,128], index: 4, kind: input, shape index: {}]   ;;  %s1673_s5 = inlined_call_operand.hbm [shape: f32[16,48], index: 5, kind: output, shape index: {}]  }
   0x1   :  { %11 = vsyncpa [#allocation4], 0 }
   0x2   :  { %13 = vsyncpa [#allocation4 + $0x1], 0  ;;  %s1453_s18 = smov 0   ;;  %s1455_s19 = smov 0  }
   0x3   :  { %s1457_s20 = smov 0   ;;  %s1459_s21 = smov 0  }
   0x4 LB: > { %s1474_s22 = sadd.s32 4294967295, %s1412_s21   ;;  %s1032_s23 = sadd.s32 4294967294, %s1412_s21   ;;  %s1412_s21 = sphi %s1459_s21, %s1681_s21   ;;  %s1408_s20 = sphi %s1457_s20, %s1680_s20   ;;  %s1404_s19 = sphi %s1455_s19, %s1679_s19   ;;  %s1400_s18 = sphi %s1453_s18, %s1678_s18  }
   0x5   : > { %s1478_s24 = sadd.s32 1, %s1412_s21   ;;  %s146_s25 = sadd.s32 1, %s1408_s20 }
   0x6   : > { %s143_s26 = ssub.s32 %s1412_s21, %s1478_s24  ;;  %p156_p0 = scmp.ne.s32.totalorder %s1408_s20, %s1404_s19 }
   0x7   : > { %p144_p1 = scmp.eq.s32.totalorder %s143_s26, 0  ;;  %p157_p2 = scmp.eq.s32.totalorder %s1474_s22, 1 }
   0x8   : > { %p162_p3 = scmp.ne.s32.totalorder %s1404_s19, %s1400_s18  ;;  %p163_p4 = scmp.eq.s32.totalorder %s1032_s23, 1 }
   0x9   : > { %s1489_s27 = scalar_select %p144_p1, %s1408_s20, %s146_s25  }
   0xa   : > { %p1491_p5 = por %p157_p2, %p156_p0  ;;  %p1495_p6 = por %p163_p4, %p162_p3 }
   0xb   : > { %p1033_p7 = scmp.ge.s32.totalorder %s1412_s21, 1  ;;  %p170_p8 = scmp.lt.s32.totalorder %s1412_s21, 3 }
   0xc   : > { %s1675_s29 = scalar_select %p1495_p6, 1, 0 }
   0xd   : > { %p1242_p9 = scmp.eq.s32.totalorder %s1474_s22, 0  ;;  %p1502_p10 = pnand %p1033_p7, %p170_p8 }
   0xe   : > { %s1414_s6 = smov [#allocation2]  }
   0xf   : > { %s182_s7 = sshll.u32 %s1414_s6, 4  ;;  %p1234_p11 = pneg %p1502_p10  ;;  %s183_s7 = int_to_ptr.vmem [resolvable:$true] %s182_s7 }
  0x10   : > { %s1333_s8 = scalar_lea.vmem %s183_s7, 4480  ;;  %p1341_p3 = scmp.lt.s32.totalorder %s183_s7, %s183_s7 }
  0x11   : > { %p1235_p12 = pnand %p1242_p9, %p1234_p11  ;;  %p1334_p0 = scmp.ne.s32.totalorder %s183_s7, %s1333_s8 }
  0x12   : > { %p1342_p4 = scmp.lt.s32.totalorder %s1333_s8, %s1333_s8 }
  0x13   : > { %p1324_p13 = pneg %p1235_p12 }
  0x14   : > { %p1343_p6 = por %p1342_p4, %p1341_p3 }
  0x15   : > { %p1336_p1 = pnand %p1334_p0, %p1324_p13 }
  0x17   : > { %p1337_p2 = pneg %p1336_p1 }
  0x19   : > { %p1344_p7 = pnand %p1343_p6, %p1337_p2 }
  0x1b   : > { %1347 = shalt.err (!%p1344_p7)
}
  0x1c   : > { %s1415_s9 = smov 64   ;;  %s1416_s10 = smov 4  }
  0x1d   : > { %1237 = dma.hbm_to_vmem [thread:$0]  (!%p1235_p12), %s1671_s3, 4480, %s183_s7, [#allocation3], %s1415_s9, %s1415_s9, %s1416_s10  }
  0x1e   : > { %222 = sbr.rel (%p1502_p10) target bundleno = 1486 (0x5ce), region = 40 }
  0x23   : > { %1391 = dma.done.wait (%p1242_p9), [#allocation3], 4480  }
  0x24   : > { %1393 = vsyncadd (%p1242_p9), [#allocation3], 4294962816  ;;  %p257_p8 = scmp.lt.s32.totalorder %s1474_s22, 1  ;;  %v1417_v0 = vmov 0.0   ;;  %vm1418_vm0 = vmmov 0   ;;  %vm282_vm1 = vcmask 1043456  }
  0x25   : > { %1130 = vmatprep.subr.bf16.mxu0 %v1417_v0  ;;  %1136 = vmatprep.subr.bf16.mxu1 %v1417_v0  ;;  %v275_v1 = vld [vmem:[#allocation2 + $0x8] sm:$0xf]  ;;  %v1285_v3 = vld [vmem:[#allocation2] sm:$0xff]   ;;  %vm278_vm2 = vcmask 64512   ;;  %vm332_vm3 = vcmask 130048   ;;  %v1288_v10 = vld [vmem:[#allocation2 + $0x38] sm:$0xff]  }
  0x26   : > { %1132 = vmatprep.mubr.msk.bf16.mxu0 %vm1418_vm0, %v1417_v0  ;;  %s258_s13 = scalar_select %p257_p8, %s1474_s22, 1  ;;  %1138 = vmatprep.mubr.msk.bf16.mxu1 %vm1418_vm0, %v1417_v0  ;;  %v284_v2 = vsel %vm282_vm1, %v275_v1, 0  ;;  %v1286_v8 = vld [vmem:[#allocation2 + $0x48] sm:$0xff]   ;;  %v1287_v9 = vld [vmem:[#allocation2 + $0x40] sm:$0xff]   ;;  %v1289_v11 = vld [vmem:[#allocation2 + $0x30] sm:$0xff]   ;;  %vm907_vm6 = vcmask 130112  }
  0x27   : > { %1131 = vmatpush3.bf16.msra.mxu0 %v284_v2  ;;  %1137 = vmatpush3.bf16.msra.mxu1 %v1285_v3  ;;  %v1290_v12 = vld [vmem:[#allocation2 + $0x28] sm:$0xff]   ;;  %v1291_v13 = vld [vmem:[#allocation2 + $0x20] sm:$0xff]   ;;  %v1292_v14 = vld [vmem:[#allocation2 + $0x18] sm:$0xff]   ;;  %s1419_s10 = smov 8   ;;  %s1420_s23 = smov 88   ;;  %vm913_vm7 = vcmask 195712  }
  0x28   : > { %s1527_s14 = sshll.u32 %s258_s13, 3  ;;  %1142 = vmatprep.subr.bf16.mxu0 %v1417_v0  ;;  %1162 = vmatprep.subr.bf16.mxu1 %v1417_v0  ;;  %v1293_v15 = vld [vmem:[#allocation2 + $0x10] sm:$0xff]   ;;  %v1294_v16 = vld [vmem:[#allocation2 + $0x88] sm:$0xff]   ;;  %v1295_v17 = vld [vmem:[#allocation2 + $0x80] sm:$0xff]   ;;  %s254_s13 = sand.u32 1, %s1404_s19   ;;  %vm919_vm8 = vcmask 261312  }
  0x29   : > { %s264_s17 = scalar_lea.vmem %s1669_s1, %s1527_s14  ;;  %s260_s26 = scalar_lea.vmem %s1668_s0, %s1527_s14  ;;  %v1296_v18 = vld [vmem:[#allocation2 + $0x78] sm:$0xff]   ;;  %v1297_v19 = vld [vmem:[#allocation2 + $0x70] sm:$0xff]   ;;  %v1298_v20 = vld [vmem:[#allocation2 + $0x68] sm:$0xff]   ;;  %vm921_vm11 = vcmask 392448  }
  0x2a   : > { %v271_v4 = vld [vmem:[%s264_s17] sm:$0xff]  ;;  %v624_v31 = vld [vmem:[#allocation2 + $0x90] sm:$0xf]  ;;  %v1300_v38 = vld [vmem:[#allocation2 + $0x58] sm:$0xff]   ;;  %s268_s9 = scalar_lea.vmem %s1670_s2, %s1527_s14  ;;  %s1038_s14 = sshll.u32 %s254_s13, 3 }
  0x2b   : > { %v277_v5 = vpack.c.bf16 %v271_v4, %v271_v4  ;;  %v270_v6 = vld [vmem:[%s260_s26] sm:$0xff]  ;;  %v638_v36 = vsel %vm282_vm1, %v624_v31, 0  ;;  %v1301_v39 = vld [vmem:[#allocation2 + $0x50] sm:$0xff]   ;;  %s1585_s17 = scalar_lea.vmem [#allocation5], %s1038_s14  ;;  %v1303_v1 = vld [vmem:[#allocation2 + $0xc8] sm:$0xff]   ;;  %s1421_s25 = smov 120  }
  0x2c   : > { %v276_v7 = vpack.c.bf16 %v270_v6, %v270_v6  ;;  %v1299_v21 = vld [vmem:[#allocation2 + $0x60] sm:$0xff]   ;;  %v1302_v63 = vld [vmem:[#allocation2 + $0xd0] sm:$0xff]   ;;  %v1317_v31 = vld [vmem:[#allocation2 + $0xd8] sm:$0xff]   ;;  %s937_s11 = sshll.u32 %s1585_s17, 4  ;;  %s924_s16 = scalar_lea.sflag [#allocation4], %s254_s13  ;;  %s1626_s11 = int_to_ptr.vmem [resolvable:$true] %s937_s11 }
  0x2d   : > { %1133 = vmatmul.mubr.msk.bf16.vlgmr.msra.gmra.mxu0 %vm278_vm2, %v277_v5  ;;  %v1045_v24 = vld [vmem:[%s1672_s4] ss:$0 sm:$0xff]  ;;  %v1046_v41 = vld [vmem:[%s1672_s4 + $0x1] ss:$0 sm:$0xff]  ;;  %v1055_v51 = vld [vmem:[%s1672_s4 + $0x2] ss:$0 sm:$0xff] }
  0x2e   : > { %1139 = vmatmul.mubr.msk.bf16.vlgmr.msra.gmra.mxu1 %vm332_vm3, %v276_v7  ;;  %1143 = vmatpush3.bf16.msra.mxu0 %v1286_v8  ;;  %v272_v40 = vld [vmem:[%s268_s9] sm:$0xff]  ;;  %v1305_v7 = vld [vmem:[#allocation2 + $0xb8] sm:$0xff]   ;;  %v1306_v8 = vld [vmem:[#allocation2 + $0xb0] sm:$0xff]  }
  0x2f   : > { %1144 = vmatprep.subr.bf16.mxu0 %v1417_v0  ;;  %1158 = vmatprep.mubr.msk.bf16.mxu0 %vm1418_vm0, %v1417_v0  ;;  %v1304_v5 = vld [vmem:[#allocation2 + $0xc0] sm:$0xff]  }
  0x30   : > { %1178 = vmatprep.mubr.msk.bf16.mxu1 %vm1418_vm0, %v1417_v0  ;;  %1163 = vmatpush3.bf16.msra.mxu1 %v1294_v16  ;;  %v1311_v16 = vld [vmem:[#allocation2 + $0x108] sm:$0xff]  }
  0x31   : > { %1164 = vmatprep.subr.bf16.mxu1 %v1417_v0  ;;  %615 = vrot.lane.b32.xlu0 %v272_v40, %s1419_s10 }
  0x32   : > { %1145 = vmatpush3.bf16.msra.mxu0 %v1287_v9  ;;  %v1307_v9 = vld [vmem:[#allocation2 + $0xa8] sm:$0xff]  }
  0x33   : > { %1146 = vmatprep.subr.bf16.mxu0 %v1417_v0 }
  0x34   : > { %1165 = vmatpush3.bf16.msra.mxu1 %v1295_v17  ;;  %v1312_v17 = vld [vmem:[#allocation2 + $0x100] sm:$0xff]  }
  0x35   : > { %1166 = vmatprep.subr.bf16.mxu1 %v1417_v0 }
  0x36   : > { %1147 = vmatpush3.bf16.msra.mxu0 %v1288_v10 }
  0x37   : > { %1148 = vmatprep.subr.bf16.mxu0 %v1417_v0 }
  0x38   : > { %1167 = vmatpush3.bf16.msra.mxu1 %v1296_v18  ;;  %v1313_v18 = vld [vmem:[#allocation2 + $0xf8] sm:$0xff]  }
  0x39   : > { %1168 = vmatprep.subr.bf16.mxu1 %v1417_v0 }
  0x3a   : > { %1149 = vmatpush3.bf16.msra.mxu0 %v1289_v11 }
  0x3b   : > { %1150 = vmatprep.subr.bf16.mxu0 %v1417_v0 }
  0x3c   : > { %1169 = vmatpush3.bf16.msra.mxu1 %v1297_v19  ;;  %v1314_v19 = vld [vmem:[#allocation2 + $0xf0] sm:$0xff]  }
  0x3d   : > { %1170 = vmatprep.subr.bf16.mxu1 %v1417_v0 }
  0x3e   : > { %1151 = vmatpush3.bf16.msra.mxu0 %v1290_v12 }
  0x3f   : > { %1152 = vmatprep.subr.bf16.mxu0 %v1417_v0 }
  0x40   : > { %1171 = vmatpush3.bf16.msra.mxu1 %v1298_v20  ;;  %v1315_v20 = vld [vmem:[#allocation2 + $0xe8] sm:$0xff]  }
  0x41   : > { %1172 = vmatprep.subr.bf16.mxu1 %v1417_v0 }
  0x42   : > { %1153 = vmatpush3.bf16.msra.mxu0 %v1291_v13  ;;  %v1308_v13 = vld [vmem:[#allocation2 + $0xa0] sm:$0xff]  }
  0x43   : > { %1154 = vmatprep.subr.bf16.mxu0 %v1417_v0 }
  0x44   : > { %1173 = vmatpush3.bf16.msra.mxu1 %v1299_v21  ;;  %v1064_v21 = vld [vmem:[%s1672_s4 + $0x3] ss:$0 sm:$0xff] }
  0x45   : > { %1174 = vmatprep.subr.bf16.mxu1 %v1417_v0 }
  0x46   : > { %1155 = vmatpush3.bf16.msra.mxu0 %v1292_v14  ;;  %v1309_v14 = vld [vmem:[#allocation2 + $0x98] sm:$0xff]  }
  0x47   : > { %1156 = vmatprep.subr.bf16.mxu0 %v1417_v0 }
  0x48   : > { %1175 = vmatpush3.bf16.msra.mxu1 %v1300_v38 }
  0x49   : > { %1176 = vmatprep.subr.bf16.mxu1 %v1417_v0 }
  0x4a   : > { %1157 = vmatpush3.bf16.msra.mxu0 %v1293_v15  ;;  %v1310_v15 = vld [vmem:[#allocation2 + $0x110] sm:$0xff]  }
  0x4b   : > { %1182 = vmatprep.subr.bf16.mxu0 %v1417_v0 }
  0x4c   : > { %1177 = vmatpush3.bf16.msra.mxu1 %v1301_v39 }
  0x4d   : > { %1188 = vmatprep.subr.bf16.mxu1 %v1417_v0 }
  0xa3   : > { %v616_v62 = vpop.permute.xlu0 %615 }
  0xed   : > { %v320_v22 = vpop.f32.mrf.mxu0 }
  0xee   : > { %v370_v23 = vpop.f32.mrf.mxu1 }
  0xef   : > { %v371_v25 = vadd.f32 %v370_v23, %v320_v22  ;;  %v1134_v26 = vpop.f32.mrf.mxu0 }
  0xf0   : > { %v1140_v27 = vpop.f32.mrf.mxu1 }
  0xf1   : > { %v381_v28 = vadd.f32 %v1045_v24, %v371_v25  ;;  %v323_v29 = vpop.f32.mrf.mxu0 }
  0xf2   : > { %v373_v30 = vpop.f32.mrf.mxu1 }
  0xf3   : > { %vm382_vm4 = vcmp.ge.f32.partialorder %v381_v28, 0.0  ;;  %v383_v32 = vmul.f32 0.01, %v381_v28  ;;  %v1135_v33 = vpop.f32.mrf.mxu0  ;;  %v1316_v30 = vld [vmem:[#allocation2 + $0xe0] sm:$0xff]  }
  0xf4   : > { %v1141_v34 = vpop.f32.mrf.mxu1 }
  0xf5   : > { %v384_v35 = vsel %vm382_vm4, %v381_v28, %v383_v32  ;;  %v1066_v32 = vld [vmem:[%s1672_s4 + $0x4] ss:$0 sm:$0xff] }
  0xf6   : > { %v401_v37 = vpack.c.bf16 %v384_v35, %v384_v35 }
  0xf8   : > { %1159 = vmatmul.mubr.bf16.vlgmr.msra.gmra.mxu0 %v401_v37 }
  0xf9   : > { %1183 = vmatpush3.bf16.msra.mxu0 %v638_v36  ;;  %1184 = vmatprep.mubr.msk.bf16.mxu0 %vm1418_vm0, %v1417_v0 }
  0xfa   : > { %1208 = vmatprep.subr.bf16.mxu0 %v1417_v0 }
 0x1b8   : > { %v489_v42 = vpop.f32.mrf.mxu0 }
 0x1b9   : > { %v490_v43 = vadd.f32 %v1046_v41, %v489_v42 }
 0x1ba   : > { %v1160_v44 = vpop.f32.mrf.mxu0 }
 0x1bb   : > { %vm497_vm5 = vcmp.ge.f32.partialorder %v490_v43, 0.0  ;;  %v498_v45 = vmul.f32 0.01, %v490_v43  ;;  %v495_v50 = vmul.f32 1.442695, %v490_v43 }
 0x1bc   : > { %v492_v46 = vpop.f32.mrf.mxu0 }
 0x1bd   : > { %v499_v47 = vsel %vm497_vm5, %v490_v43, %v498_v45  ;;  %1318 = vpow2.f32 %v495_v50 }
 0x1be   : > { %v1161_v48 = vpop.f32.mrf.mxu0  ;;  %v516_v49 = vpack.c.bf16 %v499_v47, %v499_v47 }
 0x1c0   : > { %1179 = vmatmul.mubr.bf16.vlgmr.msra.gmra.mxu1 %v516_v49 }
 0x1c1   : > { %1204 = vmatprep.mubr.msk.bf16.mxu1 %vm1418_vm0, %v1417_v0  ;;  %1189 = vmatpush3.bf16.msra.mxu1 %v1302_v63 }
 0x1c2   : > { %1190 = vmatprep.subr.bf16.mxu1 %v1417_v0 }
 0x1c5   : > { %1191 = vmatpush3.bf16.msra.mxu1 %v1303_v1 }
 0x1c6   : > { %1192 = vmatprep.subr.bf16.mxu1 %v1417_v0 }
 0x1c9   : > { %1193 = vmatpush3.bf16.msra.mxu1 %v1304_v5 }
 0x1ca   : > { %v1319_v58 = vpop.eup %1318  ;;  %1194 = vmatprep.subr.bf16.mxu1 %v1417_v0 }
 0x1cd   : > { %1195 = vmatpush3.bf16.msra.mxu1 %v1305_v7 }
 0x1ce   : > { %1196 = vmatprep.subr.bf16.mxu1 %v1417_v0 }
 0x1d1   : > { %1197 = vmatpush3.bf16.msra.mxu1 %v1306_v8 }
 0x1d2   : > { %1198 = vmatprep.subr.bf16.mxu1 %v1417_v0 }
 0x1d5   : > { %1199 = vmatpush3.bf16.msra.mxu1 %v1307_v9 }
 0x1d6   : > { %1200 = vmatprep.subr.bf16.mxu1 %v1417_v0 }
 0x1d9   : > { %1201 = vmatpush3.bf16.msra.mxu1 %v1308_v13 }
 0x1da   : > { %1202 = vmatprep.subr.bf16.mxu1 %v1417_v0 }
 0x1dd   : > { %1203 = vmatpush3.bf16.msra.mxu1 %v1309_v14 }
 0x280   : > { %v604_v52 = vpop.f32.mrf.mxu1 }
 0x281   : > { %v605_v53 = vadd.f32 %v1055_v51, %v604_v52 }
 0x282   : > { %v1180_v54 = vpop.f32.mrf.mxu1 }
 0x283   : > { %v610_v55 = vmul.f32 0.5, %v605_v53  ;;  %620 = vrot.lane.b32.xlu0 %v605_v53, %s1419_s10  ;;  %906 = vst.msk [vmem:[%s1585_s17] sm:$0xff] %vm278_vm2, %v605_v53 }
 0x284   : > { %v607_v56 = vpop.f32.mrf.mxu1 }
 0x285   : > { %v611_v57 = vmul.f32 1.442695, %v610_v55 }
 0x286   : > { %v1181_v59 = vpop.f32.mrf.mxu1 }
 0x287   : > { %1320 = vpow2.f32 %v611_v57  ;;  %916 = vrot.lane.b32.xlu0 %v1319_v58, %s1420_s23  ;;  %s1422_s23 = smov [#allocation5]  }
 0x294   : > { %v1321_v60 = vpop.eup %1320 }
 0x295   : > { %v613_v61 = vmul.f32 %v1321_v60, %v1321_v60  ;;  %v618_v2 = vmul.f32 %v1321_v60, %v616_v62 }
 0x297   : > { %908 = vst.msk [vmem:[%s1585_s17] sm:$0xff] %vm907_vm6, %v613_v61 }
 0x2f5   : > { %v621_v3 = vpop.permute.xlu0 %620 }
 0x2f6   : > { %v623_v4 = vadd.f32 %v621_v3, %v618_v2 }
 0x2f8   : > { %v625_v6 = vpack.c.bf16 %v623_v4, %v623_v4 }
 0x2f9   : > { %v917_v12 = vpop.permute.xlu0 %916 }
 0x2fa   : > { %632 = vrot.lane.b32.xlu1 %v625_v6, %s1421_s25  ;;  %s1352_s25 = sshll.u32 %s1422_s23, 4  ;;  %s1353_s25 = int_to_ptr.vmem [resolvable:$false] %s1352_s25 }
 0x2fb   : > { %s1354_s26 = scalar_lea.vmem %s1353_s25, 256  ;;  %p1355_p11 = scmp.lt.s32.totalorder %s1626_s11, %s1353_s25 }
 0x2fe   : > { %910 = vrot.lane.b32.xlu1 %v623_v4, %s1419_s10  ;;  %s1085_s10 = sshll.u32 %s1474_s22, 7  ;;  %s1348_s22 = scalar_lea.vmem %s1626_s11, 128 }
 0x2ff   : > { %s1624_s15 = scalar_lea.hbm %s1673_s5, %s1085_s10  ;;  %p1349_p6 = scmp.ne.s32.totalorder %s1626_s11, %s1348_s22 }
 0x300   : > { %p1356_p12 = scmp.lt.s32.totalorder %s1354_s26, %s1348_s22 }
 0x301   : > { %p1350_p9 = pnand %p1349_p6, %p1491_p5 }
 0x302   : > { %p1357_p13 = por %p1356_p12, %p1355_p11 }
 0x303   : > { %p1351_p10 = pneg %p1350_p9 }
 0x305   : > { %p1358_p0 = pnand %p1357_p13, %p1351_p10 }
 0x36c   : > { %v633_v10 = vpop.permute.xlu1 %632 }
 0x36d   : > { %1185 = vmatmul.mubr.msk.bf16.vlgmr.msra.gmra.mxu0 %vm278_vm2, %v633_v10 }
 0x36e   : > { %1224 = vmatprep.mubr.msk.bf16.mxu0 %vm1418_vm0, %v1417_v0  ;;  %1209 = vmatpush3.bf16.msra.mxu0 %v1310_v15 }
 0x36f   : > { %1210 = vmatprep.subr.bf16.mxu0 %v1417_v0 }
 0x370   : > { %v911_v11 = vpop.permute.xlu1 %910 }
 0x371   : > { %914 = vst.msk [vmem:[%s1585_s17] sm:$0xff] %vm913_vm7, %v911_v11 }
 0x372   : > { %920 = vst.msk [vmem:[%s1585_s17] sm:$0xff] %vm919_vm8, %v917_v12  ;;  %1211 = vmatpush3.bf16.msra.mxu0 %v1311_v16 }
 0x373   : > { %1212 = vmatprep.subr.bf16.mxu0 %v1417_v0 }
 0x376   : > { %1213 = vmatpush3.bf16.msra.mxu0 %v1312_v17 }
 0x377   : > { %1214 = vmatprep.subr.bf16.mxu0 %v1417_v0 }
 0x37a   : > { %1215 = vmatpush3.bf16.msra.mxu0 %v1313_v18 }
 0x37b   : > { %1216 = vmatprep.subr.bf16.mxu0 %v1417_v0 }
 0x37e   : > { %1217 = vmatpush3.bf16.msra.mxu0 %v1314_v19 }
 0x37f   : > { %1218 = vmatprep.subr.bf16.mxu0 %v1417_v0 }
 0x382   : > { %1219 = vmatpush3.bf16.msra.mxu0 %v1315_v20 }
 0x383   : > { %1220 = vmatprep.subr.bf16.mxu0 %v1417_v0 }
 0x386   : > { %1221 = vmatpush3.bf16.msra.mxu0 %v1316_v30 }
 0x387   : > { %1222 = vmatprep.subr.bf16.mxu0 %v1417_v0  ;;  %v1075_v0 = vld [vmem:[%s1672_s4 + $0x5] ss:$0 sm:$0xff] }
 0x38a   : > { %1223 = vmatpush3.bf16.msra.mxu0 %v1317_v31 }
 0x42d   : > { %v674_v22 = vpop.f32.mrf.mxu0 }
 0x42e   : > { %v675_v23 = vadd.f32 %v1064_v21, %v674_v22 }
 0x42f   : > { %v1186_v24 = vpop.f32.mrf.mxu0 }
 0x430   : > { %vm680_vm9 = vcmp.ge.f32.partialorder %v675_v23, 0.0  ;;  %v681_v25 = vmul.f32 0.01, %v675_v23 }
 0x431   : > { %v677_v26 = vpop.f32.mrf.mxu0 }
 0x432   : > { %v682_v27 = vsel %vm680_vm9, %v675_v23, %v681_v25 }
 0x433   : > { %v699_v28 = vpack.c.bf16 %v682_v27, %v682_v27  ;;  %v1187_v29 = vpop.f32.mrf.mxu0 }
 0x435   : > { %1205 = vmatmul.mubr.bf16.vlgmr.msra.gmra.mxu1 %v699_v28 }
 0x4f5   : > { %v787_v33 = vpop.f32.mrf.mxu1 }
 0x4f6   : > { %v788_v34 = vadd.f32 %v1066_v32, %v787_v33 }
 0x4f7   : > { %v1206_v35 = vpop.f32.mrf.mxu1 }
 0x4f8   : > { %vm793_vm10 = vcmp.ge.f32.partialorder %v788_v34, 0.0  ;;  %v794_v36 = vmul.f32 0.01, %v788_v34 }
 0x4f9   : > { %v790_v37 = vpop.f32.mrf.mxu1 }
 0x4fa   : > { %v795_v38 = vsel %vm793_vm10, %v788_v34, %v794_v36 }
 0x4fb   : > { %v812_v39 = vpack.c.bf16 %v795_v38, %v795_v38  ;;  %v1207_v40 = vpop.f32.mrf.mxu1 }
 0x4fd   : > { %1225 = vmatmul.mubr.bf16.vlgmr.msra.gmra.mxu0 %v812_v39 }
 0x5bd   : > { %v900_v41 = vpop.f32.mrf.mxu0 }
 0x5be   : > { %v901_v42 = vadd.f32 %v1075_v0, %v900_v41 }
 0x5bf   : > { %v1226_v43 = vpop.f32.mrf.mxu0 }
 0x5c0   : > { %922 = vst.msk [vmem:[%s1585_s17] sm:$0xff] %vm921_vm11, %v901_v42 }
 0x5c1   : > { %v903_v44 = vpop.f32.mrf.mxu0 }
 0x5c2   : > { %1361 = shalt.err (!%p1358_p0)
}
 0x5c3   : > { %s1362_s17 = scalar_lea.hbm %s1624_s15, 128  ;;  %s1366_s6 = scalar_lea.hbm %s1673_s5, 256 }
 0x5c4   : > { %p1363_p1 = scmp.ne.s32.totalorder %s1624_s15, %s1362_s17  ;;  %p1367_p4 = scmp.lt.s32.totalorder %s1624_s15, %s1673_s5 }
 0x5c5   : > { %p1368_p7 = scmp.lt.s32.totalorder %s1366_s6, %s1362_s17 }
 0x5c6   : > { %p1364_p2 = pnand %p1363_p1, %p1491_p5 }
 0x5c7   : > { %p1369_p8 = por %p1368_p7, %p1367_p4 }
 0x5c8   : > { %p1365_p3 = pneg %p1364_p2 }
 0x5ca   : > { %p1370_p6 = pnand %p1369_p8, %p1365_p3 }
 0x5cc   : > { %1373 = shalt.err (!%p1370_p6)
}
 0x5cd   : > { %1232 = dma.vmem_to_hbm [thread:$0]  (%p1491_p5), %s1626_s11, 128, %s1624_s15, %s924_s16   ;;  %v1227_v45 = vpop.f32.mrf.mxu0 }
 0x5ce PF: > { %p1244_p9 = scmp.ge.s32.totalorder %s1412_s21, 2  ;;  %s949_s9 = sand.u32 1, %s1400_s18  }
 0x5cf   : > { %p1677_p10 = scmp.ne.s32.totalorder %s1675_s29, 0  ;;  %s950_s10 = scalar_lea.sflag [#allocation4], %s949_s9 }
 0x5d1   : > { %p1239_p11 = pnand %p1244_p9, %p1677_p10 }
 0x5d3   : > { %p1240_p12 = pneg %p1239_p11 }
 0x5d5   : > { %1395 = dma.done.wait (%p1240_p12), %s950_s10, 128  }
 0x5d6   : > { %1397 = vsyncadd (%p1240_p12), %s950_s10, 4294967168  ;;  %p16_p13 = scmp.ge.s32.totalorder %s1478_s24, 4   ;;  %s1678_s18 = smov %s1404_s19 }
 0x5d7   : > { %s1679_s19 = smov %s1408_s20  ;;  %s1680_s20 = smov %s1489_s27 }
 0x5d8   : > { %s1681_s21 = smov %s1478_s24  ;;  %18 = sbr.rel (!%p16_p13) target bundleno = 4 (0x4), region = 86 }
 0x5dd   :  { %955 = vsyncpa [#allocation3], 1 }
 0x5de   :  { %957 = vsyncpa [#allocation3 + $0x1], 1 }
 0x5df   :  { %958 = vsyncpa [#allocation4], 1 }
 0x5e0   :  { %960 = vsyncpa [#allocation4 + $0x1], 1 }

</bundles_post_ra>
